<compile_context>
chip_gen: v5e
topology: v5e:2x2
jax: 0.10.0
libtpu: 0.0.40
codegen_flags: <defaults>
</compile_context>

<pallas_src>
import functools
import numpy as np

import jax
import jax.numpy as jnp
from jax.experimental import pallas as pl
from jax.experimental.pallas import tpu as pltpu


# ----------------------- graph utilities (numpy, same as reference) ---------

def k_adjacency(A, k, with_self=False, self_factor=1):
    Iden = np.eye(len(A), dtype=A.dtype)
    if k == 0:
        return Iden
    Ak = np.minimum(np.linalg.matrix_power(A + Iden, k), 1) \
       - np.minimum(np.linalg.matrix_power(A + Iden, k - 1), 1)
    if with_self:
        Ak = Ak + self_factor * Iden
    return Ak


def normalize_digraph(A, dim=0):
    Dl = np.sum(A, dim)
    h, w = A.shape
    Dn = np.zeros((w, w))
    for i in range(w):
        if Dl[i] > 0:
            Dn[i, i] = Dl[i] ** (-1)
    return np.dot(A, Dn)


def build_st_graph(A, window_size):
    V = len(A)
    A_with_I = A + np.eye(V, dtype=A.dtype)
    return np.tile(A_with_I, (window_size, window_size)).copy()


# ----------------------- Pallas kernel --------------------------------------

def _st_msgcn_kernel(x_ref, A_ref, w1_ref, b1_ref, o_ref, *, C, tT):
    # x_ref : (1, tT*C, V)  bf16   input tile, rows ordered (t, c) t-major
    # A_ref : (K, V, V)     bf16   A + PA (multi-scale ST adjacency)
    # w1_ref: (E, K*C)      bf16   1x1-conv weight with eval-mode BN folded in
    # b1_ref: (E, 1)        f32    folded bias (broadcasts along lanes)
    # o_ref : (1, E, tT*V)  f32    lane-dense output block
    K = A_ref.shape[0]
    x2 = x_ref[0]                                          # (tT*C, V)

    # 1) Multi-scale graph aggregation: one 2-D MXU matmul per scale with the
    #    whole (t, c) tile folded into the M dimension (f32 accumulation).
    g_rows = []
    for k in range(K):                                     # K static & small
        gk = jnp.dot(x2, A_ref[k],
                     preferred_element_type=jnp.float32)   # (tT*C, V), f32
        # Sublane->lane migration: rows (t, c) -> rows c, lanes (t, v), so the
        # channel contraction below is one lane-dense 2-D matmul.  Static
        # row-block slices + a lane concatenate only (robust lowering).
        gk_wide = jnp.concatenate(
            [gk[t * C:(t + 1) * C, :] for t in range(tT)], axis=1)  # (C, tT*V)
        g_rows.append(gk_wide)
    G = jnp.concatenate(g_rows, axis=0).astype(jnp.bfloat16)        # (K*C, tT*V)

    # 2) 1x1-conv MLP (+ folded BN): single fused (E, K*C) @ (K*C, tT*V) matmul.
    h = jnp.dot(w1_ref[...], G,
                preferred_element_type=jnp.float32)        # (E, tT*V), f32
    h = h + b1_ref[...]                                    # bias (f32)
    # residual = 0 (module default residual=False); the module applies ReLU
    # twice back-to-back (MLP act + self.act) -> idempotent, apply once.
    h = jnp.maximum(h, 0.0)
    o_ref[0] = h.astype(o_ref.dtype)


def st_msgcn_pallas(x, A_eff, w1_eff, b1_eff, *, tT=None):
    """x: (N, C, T, V) f32 (module NCHW). Returns (N, out_channels, T, V) f32."""
    N, C, T, V = x.shape
    K = A_eff.shape[0]
    E = w1_eff.shape[0]
    if tT is None:
        tT = T
    assert T % tT == 0, "time tile must divide T"
    # Prefer tT*V to be a multiple of 128 so output stores are lane-dense.

    # Wrapper-side layout plumbing (XLA, outside the kernel):
    #  time-major, row-flattened (t, c) input; bf16 data, f32 bias.
    x_tc = jnp.transpose(x, (0, 2, 1, 3)).reshape(N, T * C, V).astype(jnp.bfloat16)
    A_bf = A_eff.astype(jnp.bfloat16)
    w1_bf = w1_eff.astype(jnp.bfloat16)
    b1_f = b1_eff.reshape(E, 1).astype(jnp.float32)

    kernel = functools.partial(_st_msgcn_kernel, C=C, tT=tT)
    out = pl.pallas_call(
        kernel,
        out_shape=jax.ShapeDtypeStruct((N, E, T * V), jnp.float32),
        grid_spec=pltpu.PrefetchScalarGridSpec(
            num_scalar_prefetch=0,
            grid=(N, T // tT),
            in_specs=[
                pl.BlockSpec((1, tT * C, V), lambda n, t: (n, t, 0)),
                pl.BlockSpec((K, V, V), lambda n, t: (0, 0, 0)),
                pl.BlockSpec((E, K * C), lambda n, t: (0, 0)),
                pl.BlockSpec((E, 1), lambda n, t: (0, 0)),
            ],
            out_specs=pl.BlockSpec((1, E, tT * V), lambda n, t: (n, 0, t)),
        ),
        compiler_params=pltpu.CompilerParams(
            dimension_semantics=("parallel", "parallel")),
    )(x_tc, A_bf, w1_bf, b1_f)
    # (N, E, T*V) is contiguous (t-major, v-minor) -> free reshape to NCHW.
    return out.reshape(N, E, T, V)


# ----------------------- pure-JAX reference (mirrors PyTorch forward) -------

def reference_forward(x, A_eff, w1, b1, g1, be1, m1, v1, eps):
    N, C, T, V = x.shape
    K = A_eff.shape[0]
    agg = jnp.einsum('kvu,nctv->nkctu', A_eff, x).reshape(N, K * C, T, V)
    h = jnp.einsum('oc,nctv->notv', w1, agg) + b1[None, :, None, None]
    h = (h - m1[None, :, None, None]) / jnp.sqrt(v1[None, :, None, None] + eps) \
        * g1[None, :, None, None] + be1[None, :, None, None]
    h = jax.nn.relu(h)                 # MLP activation
    # residual(x) = 0  (module default residual=False)
    return jax.nn.relu(h)              # self.act


# ----------------------- main ------------------------------------------------

if __name__ == "__main__":
    # ST_MSGCN config: in_channels=4, out_channels=8, num_scales=3,
    # window_size=2 on an 8-joint chain skeleton -> ST-graph size V = 16.
    N, C_in, T = 2, 4, 16
    V_base, window_size = 8, 2
    out_channels, num_scales = 8, 3
    eps = 1e-5

    # deterministic skeleton adjacency: chain graph on V_base joints
    A0 = np.zeros((V_base, V_base), dtype=np.float32)
    for i in range(V_base - 1):
        A0[i, i + 1] = 1.0
        A0[i + 1, i] = 1.0

    # spatio-temporal multi-scale adjacency (exactly as the PyTorch module)
    A_large = build_st_graph(A0, window_size)                       # (V, V)
    A_scales = np.stack(
        [normalize_digraph(k_adjacency(A_large, k, with_self=True))
         for k in range(num_scales)]).astype(np.float32)            # (K, V, V)
    V = A_large.shape[0]                                            # 16

    key = jax.random.PRNGKey(0)
    ks = jax.random.split(key, 8)

    # PA parameter: nn.init.uniform_(-1e-6, 1e-6); forward uses A + PA
    PA = jax.random.uniform(ks[0], A_scales.shape, jnp.float32, -1e-6, 1e-6)
    A_eff = jnp.asarray(A_scales) + PA

    # MLP: Conv2d(K*C -> out_channels, 1x1), BatchNorm2d(out_channels), ReLU
    E = out_channels
    w1 = 0.1 * jax.random.normal(ks[1], (E, num_scales * C_in), jnp.float32)
    b1 = 0.1 * jax.random.normal(ks[2], (E,), jnp.float32)
    g1 = 1.0 + 0.1 * jax.random.normal(ks[3], (E,), jnp.float32)
    be1 = 0.1 * jax.random.normal(ks[4], (E,), jnp.float32)
    m1 = 0.1 * jax.random.normal(ks[5], (E,), jnp.float32)
    v1 = 1.0 + 0.2 * jax.random.uniform(ks[6], (E,), jnp.float32)

    # input x: (N, C, T, V) NCHW with V = window_size * V_base
    x = jax.random.normal(ks[7], (N, C_in, T, V), jnp.float32)

    # fold eval-mode BatchNorm into the 1x1-conv weights/bias
    s1 = g1 / jnp.sqrt(v1 + eps)
    w1_eff = w1 * s1[:, None]                    # (E, K*C)
    b1_eff = s1 * (b1 - m1) + be1                # (E,)

    out = st_msgcn_pallas(x, A_eff, w1_eff, b1_eff, tT=8)
    out = jax.block_until_ready(out)

    ref = reference_forward(x, A_eff, w1, b1, g1, be1, m1, v1, eps)
    ref = jax.block_until_ready(ref)

    # kernel runs its matmuls on bf16 data (f32 accumulation) -> 2e-2 tolerance
    np.testing.assert_allclose(np.asarray(out), np.asarray(ref),
                               rtol=2e-2, atol=2e-2)
    print("KERNEL_OK")
</pallas_src>

<mosaic_0001>
module attributes {stable_mosaic.version = 11 : i64} {
  func.func @_st_msgcn_kernel(%arg0: i32, %arg1: i32, %arg2: memref<1x32x16xbf16, #tpu.memory_space<vmem>>, %arg3: memref<3x16x16xbf16, #tpu.memory_space<vmem>>, %arg4: memref<8x12xbf16, #tpu.memory_space<vmem>>, %arg5: memref<8x1xf32, #tpu.memory_space<vmem>>, %arg6: memref<1x8x128xf32, #tpu.memory_space<vmem>>) attributes {dimension_semantics = [#tpu.dimension_semantics<parallel>, #tpu.dimension_semantics<parallel>], iteration_bounds = array<i64: 2, 2>, scalar_prefetch = 0 : i64, scratch_operands = 0 : i64, tpu.core_type = #tpu.core_type<tc>, window_params = [{transform_indices = @transform_0, window_bounds = array<i64: 1, 32, 16>}, {pipeline_mode = #tpu.pipeline_mode<synchronous>, transform_indices = @transform_1, window_bounds = array<i64: 3, 16, 16>}, {pipeline_mode = #tpu.pipeline_mode<synchronous>, transform_indices = @transform_2, window_bounds = array<i64: 8, 12>}, {pipeline_mode = #tpu.pipeline_mode<synchronous>, transform_indices = @transform_3, window_bounds = array<i64: 8, 1>}, {transform_indices = @transform_4, window_bounds = array<i64: 1, 8, 128>}]} {
    %c0 = arith.constant 0 : index
    %c0_0 = arith.constant 0 : index
    %c0_1 = arith.constant 0 : index
    %0 = vector.load %arg2[%c0, %c0_0, %c0_1] : memref<1x32x16xbf16, #tpu.memory_space<vmem>>, vector<1x32x16xbf16>
    %1 = vector.shape_cast %0 : vector<1x32x16xbf16> to vector<32x16xbf16>
    %c0_2 = arith.constant 0 : index
    %c0_3 = arith.constant 0 : index
    %c0_4 = arith.constant 0 : index
    %2 = vector.load %arg3[%c0_2, %c0_3, %c0_4] : memref<3x16x16xbf16, #tpu.memory_space<vmem>>, vector<1x16x16xbf16>
    %3 = vector.shape_cast %2 : vector<1x16x16xbf16> to vector<16x16xbf16>
    %cst = arith.constant dense<0.000000e+00> : vector<32x16xf32>
    %4 = tpu.matmul %1, %3, %cst {dimension_numbers = #tpu.dot_dimension_numbers<[1], [0], [0], [1], [0, 0, 1, 1], [], []>} : vector<32x16xbf16>, vector<16x16xbf16>, vector<32x16xf32> -> vector<32x16xf32>
    %5 = vector.extract_strided_slice %4 {offsets = [0, 0], sizes = [4, 16], strides = [1, 1]} : vector<32x16xf32> to vector<4x16xf32>
    %6 = vector.extract_strided_slice %4 {offsets = [4, 0], sizes = [4, 16], strides = [1, 1]} : vector<32x16xf32> to vector<4x16xf32>
    %7 = vector.extract_strided_slice %4 {offsets = [8, 0], sizes = [4, 16], strides = [1, 1]} : vector<32x16xf32> to vector<4x16xf32>
    %8 = vector.extract_strided_slice %4 {offsets = [12, 0], sizes = [4, 16], strides = [1, 1]} : vector<32x16xf32> to vector<4x16xf32>
    %9 = vector.extract_strided_slice %4 {offsets = [16, 0], sizes = [4, 16], strides = [1, 1]} : vector<32x16xf32> to vector<4x16xf32>
    %10 = vector.extract_strided_slice %4 {offsets = [20, 0], sizes = [4, 16], strides = [1, 1]} : vector<32x16xf32> to vector<4x16xf32>
    %11 = vector.extract_strided_slice %4 {offsets = [24, 0], sizes = [4, 16], strides = [1, 1]} : vector<32x16xf32> to vector<4x16xf32>
    %12 = vector.extract_strided_slice %4 {offsets = [28, 0], sizes = [4, 16], strides = [1, 1]} : vector<32x16xf32> to vector<4x16xf32>
    %13 = tpu.concatenate %5, %6, %7, %8, %9, %10, %11, %12 in 1 : vector<4x16xf32>, vector<4x16xf32>, vector<4x16xf32>, vector<4x16xf32>, vector<4x16xf32>, vector<4x16xf32>, vector<4x16xf32>, vector<4x16xf32> -> vector<4x128xf32>
    %c1 = arith.constant 1 : index
    %c0_5 = arith.constant 0 : index
    %c0_6 = arith.constant 0 : index
    %14 = vector.load %arg3[%c1, %c0_5, %c0_6] : memref<3x16x16xbf16, #tpu.memory_space<vmem>>, vector<1x16x16xbf16>
    %15 = vector.shape_cast %14 : vector<1x16x16xbf16> to vector<16x16xbf16>
    %cst_7 = arith.constant dense<0.000000e+00> : vector<32x16xf32>
    %16 = tpu.matmul %1, %15, %cst_7 {dimension_numbers = #tpu.dot_dimension_numbers<[1], [0], [0], [1], [0, 0, 1, 1], [], []>} : vector<32x16xbf16>, vector<16x16xbf16>, vector<32x16xf32> -> vector<32x16xf32>
    %17 = vector.extract_strided_slice %16 {offsets = [0, 0], sizes = [4, 16], strides = [1, 1]} : vector<32x16xf32> to vector<4x16xf32>
    %18 = vector.extract_strided_slice %16 {offsets = [4, 0], sizes = [4, 16], strides = [1, 1]} : vector<32x16xf32> to vector<4x16xf32>
    %19 = vector.extract_strided_slice %16 {offsets = [8, 0], sizes = [4, 16], strides = [1, 1]} : vector<32x16xf32> to vector<4x16xf32>
    %20 = vector.extract_strided_slice %16 {offsets = [12, 0], sizes = [4, 16], strides = [1, 1]} : vector<32x16xf32> to vector<4x16xf32>
    %21 = vector.extract_strided_slice %16 {offsets = [16, 0], sizes = [4, 16], strides = [1, 1]} : vector<32x16xf32> to vector<4x16xf32>
    %22 = vector.extract_strided_slice %16 {offsets = [20, 0], sizes = [4, 16], strides = [1, 1]} : vector<32x16xf32> to vector<4x16xf32>
    %23 = vector.extract_strided_slice %16 {offsets = [24, 0], sizes = [4, 16], strides = [1, 1]} : vector<32x16xf32> to vector<4x16xf32>
    %24 = vector.extract_strided_slice %16 {offsets = [28, 0], sizes = [4, 16], strides = [1, 1]} : vector<32x16xf32> to vector<4x16xf32>
    %25 = tpu.concatenate %17, %18, %19, %20, %21, %22, %23, %24 in 1 : vector<4x16xf32>, vector<4x16xf32>, vector<4x16xf32>, vector<4x16xf32>, vector<4x16xf32>, vector<4x16xf32>, vector<4x16xf32>, vector<4x16xf32> -> vector<4x128xf32>
    %c2 = arith.constant 2 : index
    %c0_8 = arith.constant 0 : index
    %c0_9 = arith.constant 0 : index
    %26 = vector.load %arg3[%c2, %c0_8, %c0_9] : memref<3x16x16xbf16, #tpu.memory_space<vmem>>, vector<1x16x16xbf16>
    %27 = vector.shape_cast %26 : vector<1x16x16xbf16> to vector<16x16xbf16>
    %cst_10 = arith.constant dense<0.000000e+00> : vector<32x16xf32>
    %28 = tpu.matmul %1, %27, %cst_10 {dimension_numbers = #tpu.dot_dimension_numbers<[1], [0], [0], [1], [0, 0, 1, 1], [], []>} : vector<32x16xbf16>, vector<16x16xbf16>, vector<32x16xf32> -> vector<32x16xf32>
    %29 = vector.extract_strided_slice %28 {offsets = [0, 0], sizes = [4, 16], strides = [1, 1]} : vector<32x16xf32> to vector<4x16xf32>
    %30 = vector.extract_strided_slice %28 {offsets = [4, 0], sizes = [4, 16], strides = [1, 1]} : vector<32x16xf32> to vector<4x16xf32>
    %31 = vector.extract_strided_slice %28 {offsets = [8, 0], sizes = [4, 16], strides = [1, 1]} : vector<32x16xf32> to vector<4x16xf32>
    %32 = vector.extract_strided_slice %28 {offsets = [12, 0], sizes = [4, 16], strides = [1, 1]} : vector<32x16xf32> to vector<4x16xf32>
    %33 = vector.extract_strided_slice %28 {offsets = [16, 0], sizes = [4, 16], strides = [1, 1]} : vector<32x16xf32> to vector<4x16xf32>
    %34 = vector.extract_strided_slice %28 {offsets = [20, 0], sizes = [4, 16], strides = [1, 1]} : vector<32x16xf32> to vector<4x16xf32>
    %35 = vector.extract_strided_slice %28 {offsets = [24, 0], sizes = [4, 16], strides = [1, 1]} : vector<32x16xf32> to vector<4x16xf32>
    %36 = vector.extract_strided_slice %28 {offsets = [28, 0], sizes = [4, 16], strides = [1, 1]} : vector<32x16xf32> to vector<4x16xf32>
    %37 = tpu.concatenate %29, %30, %31, %32, %33, %34, %35, %36 in 1 : vector<4x16xf32>, vector<4x16xf32>, vector<4x16xf32>, vector<4x16xf32>, vector<4x16xf32>, vector<4x16xf32>, vector<4x16xf32>, vector<4x16xf32> -> vector<4x128xf32>
    %38 = tpu.concatenate %13, %25, %37 in 0 : vector<4x128xf32>, vector<4x128xf32>, vector<4x128xf32> -> vector<12x128xf32>
    %39 = arith.truncf %38 : vector<12x128xf32> to vector<12x128xbf16>
    %c0_11 = arith.constant 0 : index
    %c0_12 = arith.constant 0 : index
    %40 = vector.load %arg4[%c0_11, %c0_12] : memref<8x12xbf16, #tpu.memory_space<vmem>>, vector<8x12xbf16>
    %cst_13 = arith.constant dense<0.000000e+00> : vector<8x128xf32>
    %41 = tpu.matmul %40, %39, %cst_13 {dimension_numbers = #tpu.dot_dimension_numbers<[1], [0], [0], [1], [0, 0, 1, 1], [], []>} : vector<8x12xbf16>, vector<12x128xbf16>, vector<8x128xf32> -> vector<8x128xf32>
    %c0_14 = arith.constant 0 : index
    %c0_15 = arith.constant 0 : index
    %42 = vector.load %arg5[%c0_14, %c0_15] : memref<8x1xf32, #tpu.memory_space<vmem>>, vector<8x1xf32>
    %43 = vector.broadcast %42 : vector<8x1xf32> to vector<8x128xf32>
    %44 = arith.addf %41, %43 : vector<8x128xf32>
    %cst_16 = arith.constant 0.000000e+00 : f32
    %45 = vector.broadcast %cst_16 : f32 to vector<8x128xf32>
    %46 = arith.maximumf %44, %45 : vector<8x128xf32>
    %c0_17 = arith.constant 0 : index
    %c0_18 = arith.constant 0 : index
    %c0_19 = arith.constant 0 : index
    %47 = vector.load %arg6[%c0_17, %c0_18, %c0_19] : memref<1x8x128xf32, #tpu.memory_space<vmem>>, vector<1x8x128xf32>
    %48 = vector.shape_cast %47 : vector<1x8x128xf32> to vector<8x128xf32>
    %49 = vector.shape_cast %46 : vector<8x128xf32> to vector<1x8x128xf32>
    tpu.vector_store %arg6[%c0_17, %c0_18, %c0_19], %49 {strides = array<i32>} : memref<1x8x128xf32, #tpu.memory_space<vmem>>, vector<1x8x128xf32>,
    return
  }
  func.func @transform_0(%arg0: i32, %arg1: i32) -> (i32, i32, i32) {
    %c0_i32 = arith.constant 0 : i32
    %c0_i32_0 = arith.constant 0 : i32
    return %arg0, %arg1, %c0_i32 : i32, i32, i32
  }
  func.func @transform_1(%arg0: i32, %arg1: i32) -> (i32, i32, i32) {
    %c0_i32 = arith.constant 0 : i32
    %c0_i32_0 = arith.constant 0 : i32
    %c0_i32_1 = arith.constant 0 : i32
    %c0_i32_2 = arith.constant 0 : i32
    return %c0_i32, %c0_i32_0, %c0_i32_1 : i32, i32, i32
  }
  func.func @transform_2(%arg0: i32, %arg1: i32) -> (i32, i32) {
    %c0_i32 = arith.constant 0 : i32
    %c0_i32_0 = arith.constant 0 : i32
    %c0_i32_1 = arith.constant 0 : i32
    return %c0_i32, %c0_i32_0 : i32, i32
  }
  func.func @transform_3(%arg0: i32, %arg1: i32) -> (i32, i32) {
    %c0_i32 = arith.constant 0 : i32
    %c0_i32_0 = arith.constant 0 : i32
    %c0_i32_1 = arith.constant 0 : i32
    return %c0_i32, %c0_i32_0 : i32, i32
  }
  func.func @transform_4(%arg0: i32, %arg1: i32) -> (i32, i32, i32) {
    %c0_i32 = arith.constant 0 : i32
    %c0_i32_0 = arith.constant 0 : i32
    return %arg0, %c0_i32, %arg1 : i32, i32, i32
  }
}

</mosaic_0001>

<bundles_post_ra>
// kernel: tpu_custom_call.1
= control target key start
LH: loop header
LB: loop body
LE: loop exit
PB: predicated region body
PF: predicated region fallthrough
CT: control target
= control target key end

     0   :  { %9 = vsyncpa [#allocation3], 0  ;;  %s1044_s0 = inlined_call_operand.vmem [shape: bf16[2,64,16], index: 0, kind: input, shape index: {}]   ;;  %s1045_s1 = inlined_call_operand.vmem [shape: bf16[3,16,16], index: 1, kind: input, shape index: {}]   ;;  %s1046_s2 = inlined_call_operand.vmem [shape: bf16[8,12], index: 2, kind: input, shape index: {}]   ;;  %s1047_s3 = inlined_call_operand.vmem [shape: f32[8,1], index: 3, kind: input, shape index: {}]   ;;  %s1048_s4 = inlined_call_operand.hbm [shape: f32[2,8,256], index: 4, kind: output, shape index: {}]  }
   0x1   :  { %11 = vsyncpa [#allocation3 + $0x1], 0  ;;  %s872_s15 = smov 0   ;;  %s874_s16 = smov 0  }
   0x2   :  { %s876_s17 = smov 0   ;;  %s878_s18 = smov 0  }
   0x3   :  { %s880_s19 = smov 0   ;;  %s882_s20 = smov 0  }
   0x4   :  { %s884_s21 = smov 0   ;;  %s886_s22 = smov 0  }
   0x5 LB: > { %s577_s23 = sadd.s32 4294967295, %s837_s22   ;;  %s578_s24 = sadd.s32 4294967294, %s837_s22   ;;  %s837_s22 = sphi %s886_s22, %s17_s22   ;;  %s833_s21 = sphi %s884_s21, %s1057_s21   ;;  %s829_s20 = sphi %s882_s20, %s1056_s20   ;;  %s825_s19 = sphi %s880_s19, %s1055_s19   ;;  %s821_s18 = sphi %s878_s18, %s1054_s18   ;;  %s817_s17 = sphi %s876_s17, %s1053_s17   ;;  %s813_s16 = sphi %s874_s16, %s1052_s16   ;;  %s809_s15 = sphi %s872_s15, %s1051_s15  }
   0x6   : > { %s26_s25 = sadd.s32 1, %s829_s20  ;;  %s29_s26 = sadd.s32 1, %s833_s21 }
   0x7   : > { %p27_p0 = scmp.ge.s32.totalorder %s26_s25, 2  ;;  %p139_p1 = scmp.ne.s32.totalorder %s817_s17, %s813_s16 }
   0x8   : > { %p140_p2 = scmp.eq.s32.totalorder %s577_s23, 3  ;;  %p145_p5 = scmp.ne.s32.totalorder %s813_s16, %s809_s15 }
   0x9   : > { %s1059_s25 = smov (%p27_p0, %s26_s25), 0  ;;  %s1061_s26 = smov (!%p27_p0, %s29_s26), %s833_s21 }
   0xa   : > { %s125_s27 = ssub.s32 %s829_s20, %s1059_s25  ;;  %p923_p3 = por %p140_p2, %p139_p1 }
   0xb   : > { %p31_p4 = scmp.ge.s32.totalorder %s1061_s26, 2  ;;  %p146_p6 = scmp.eq.s32.totalorder %s578_s24, 3 }
   0xc   : > { %p581_p7 = scmp.ge.s32.totalorder %s837_s22, 1  ;;  %p186_p9 = scmp.lt.s32.totalorder %s837_s22, 5 }
   0xd   : > { %s1063_s26 = smov (%p31_p4, %s1061_s26), 0  ;;  %p932_p8 = por %p146_p6, %p145_p5 }
   0xe   : > { %s124_s30 = ssub.s32 %s833_s21, %s1063_s26  ;;  %s129_s5 = sadd.s32 1, %s817_s17 }
   0xf   : > { %s126_s6 = sor.u32 %s125_s27, %s124_s30  ;;  %p187_p10 = pnand %p581_p7, %p186_p9 }
  0x10   : > { %p127_p11 = scmp.eq.s32.totalorder %s126_s6, 0  ;;  %s583_s14 = sshll.u32 (!%p187_p10), %s821_s18, 2 }
  0x11   : > { %190 = sbr.rel (%p187_p10) target bundleno = 461 (0x1cd), region = 36  ;;  %p217_p12 = scmp.lt.s32.totalorder (!%p187_p10), %s825_s19, 1 }
  0x12   : > { %s941_s7 = scalar_select %p127_p11, %s817_s17, %s129_s5  }
  0x13   : > { %p219_p13 = scmp.lt.s32.totalorder (!%p187_p10), %s583_s14, 7  ;;  %s839_s9 = smov (!%p187_p10), 16  }
  0x14   : > { %s840_s10 = smov (!%p187_p10), 32   ;;  %s841_s11 = smov (!%p187_p10), 48  }
  0x15   : > { %s842_s12 = smov (!%p187_p10), 64   ;;  %s843_s13 = smov (!%p187_p10), 80  }
  0x16   : > { %v624_v0 = vld [vmem:[%s1045_s1] sm:$0xff]  ;;  %v625_v1 = vld [vmem:[%s1045_s1 + $0x8] sm:$0xff]  ;;  %v626_v2 = vld [vmem:[%s1045_s1 + $0x10] sm:$0xff]  ;;  %s218_s23 = scalar_select %p217_p12, %s825_s19, 1  ;;  %vm249_vm0 = vcmask 130048   ;;  %v846_v43 = vmov 0  }
  0x17   : > { %263 = vmatpush.bf16.msra.mxu0 %v624_v0  ;;  %333 = vmatpush.bf16.msra.mxu1 %v625_v1  ;;  %s1065_s14 = smov (!%p219_p13, %s583_s14), 7  ;;  %v452_v41 = vld [vmem:[%s1047_s3] sm:$0xff]  ;;  %vm305_vm1 = vcmask 261120   ;;  %vm307_vm2 = vcmask 392192   ;;  %vm309_vm3 = vcmask 523264   ;;  %vm311_vm4 = vcmask 654336  }
  0x18   : > { %397 = vmatpush.bf16.msra.mxu2 %v626_v2  ;;  %s584_s24 = sshll.u32 %s218_s23, 3  ;;  %s845_s23 = smov 96   ;;  %741 = vset.pattern.permute.xlu2 %v846_v43  ;;  %vm315_vm5 = vcmask 916480   ;;  %vm313_vm6 = vcmask 785408   ;;  %vm448_vm7 = vcmask 1043456   ;;  %vm462_vm8 = vcmask 1045504  }
  0x19   : > { %s222_s27 = sadd.s32 %s584_s24, %s1065_s14  ;;  %s844_s14 = smov 112   ;;  %742 = vset.pattern.permute.xlu0 %v846_v43  ;;  %vm458_vm9 = vcmask 97280  }
  0x1a   : > { %s585_s30 = sshll.u32 %s222_s27, 2  ;;  %s618_s6 = sshll.u32 %s825_s19, 1 }
  0x1b   : > { %s224_s8 = scalar_lea.vmem %s1044_s0, %s585_s30 }
  0x1c   : > { %v622_v3 = vld [vmem:[%s224_s8] sm:$0xff]  ;;  %v623_v4 = vld [vmem:[%s224_s8 + $0x8] sm:$0xff]  ;;  %s213_s8 = sand.u32 1, %s813_s16  }
  0x1d   : > { %598 = vmatmul.msk.bf16.vlgmr.msra.gmra.mxu0 %vm249_vm0, %v622_v3  ;;  %606 = vmatmul.msk.bf16.vlgmr.msra.gmra.mxu1 %vm249_vm0, %v622_v3  ;;  %s482_s19 = scalar_lea.sflag [#allocation3], %s213_s8 }
  0x1e   : > { %614 = vmatmul.msk.bf16.vlgmr.msra.gmra.mxu2 %vm249_vm0, %v622_v3 }
  0x2d   : > { %599 = vmatmul.msk.bf16.gmra.mxu0 %vm249_vm0, %v623_v4  ;;  %607 = vmatmul.msk.bf16.gmra.mxu1 %vm249_vm0, %v623_v4 }
  0x2e   : > { %615 = vmatmul.msk.bf16.gmra.mxu2 %vm249_vm0, %v623_v4 }
  0x9a   : > { %v964_v5 = vpop.f32.mrf.mxu0  ;;  %v966_v6 = vpop.f32.mrf.mxu1 }
  0x9b   : > { %v276_v7 = vrot.slane %v964_v5, 4  ;;  %v346_v8 = vrot.slane %v966_v6, 4 }
  0x9d   : > { %v706_v9 = vpack.i.bf16 %v276_v7, %v346_v8 }
  0x9f   : > { %707 = vrot.lane.b32.xlu0 %v706_v9, %s839_s9 }
  0xa1   : > { %v970_v10 = vpop.f32.mrf.mxu2 }
  0xa2   : > { %v267_v11 = vpop.f32.mrf.mxu0  ;;  %v337_v12 = vpop.f32.mrf.mxu1  ;;  %v410_v13 = vrot.slane %v970_v10, 4 }
  0xa3   : > { %v284_v14 = vrot.slane %v267_v11, 4  ;;  %v354_v15 = vrot.slane %v337_v12, 4  ;;  %v711_v16 = vpack.i.bf16 %v267_v11, %v337_v12 }
  0xa4   : > { %411 = vrot.lane.b32.xlu2 %v410_v13, %s839_s9  ;;  %s492_s9 = sadd.s32 %s821_s18, %s618_s6 }
  0xa5   : > { %v716_v17 = vpack.i.bf16 %v284_v14, %v354_v15 }
  0xa7   : > { %712 = vrot.lane.b32.xlu0 %v711_v16, %s840_s10  ;;  %717 = vrot.lane.b32.xlu1 %v716_v17, %s841_s11 }
  0xa9   : > { %v401_v18 = vpop.f32.mrf.mxu2 }
  0xaa   : > { %v418_v19 = vrot.slane %v401_v18, 4  ;;  %v270_v20 = vpop.f32.mrf.mxu0  ;;  %v340_v21 = vpop.f32.mrf.mxu1 }
  0xab   : > { %v721_v22 = vpack.i.bf16 %v270_v20, %v340_v21  ;;  %v292_v23 = vrot.slane %v270_v20, 4  ;;  %v362_v24 = vrot.slane %v340_v21, 4 }
  0xac   : > { %419 = vrot.lane.b32.xlu2 %v418_v19, %s841_s11  ;;  %s619_s11 = sshll.u32 %s492_s9, 3  ;;  %s763_s9 = scalar_lea.hbm %s1048_s4, 32 }
  0xad   : > { %v726_v25 = vpack.i.bf16 %v292_v23, %v362_v24 }
  0xaf   : > { %415 = vrot.lane.b32.xlu0 %v401_v18, %s840_s10  ;;  %722 = vrot.lane.b32.xlu1 %v721_v22, %s842_s12  ;;  %s582_s10 = sshll.u32 %s213_s8, 3 }
  0xb1   : > { %v404_v30 = vpop.f32.mrf.mxu2 }
  0xb2   : > { %v272_v26 = vpop.f32.mrf.mxu0  ;;  %v342_v27 = vpop.f32.mrf.mxu1  ;;  %v426_v32 = vrot.slane %v404_v30, 4 }
  0xb3   : > { %v300_v28 = vrot.slane %v272_v26, 4  ;;  %v370_v29 = vrot.slane %v342_v27, 4  ;;  %v731_v33 = vpack.i.bf16 %v272_v26, %v342_v27  ;;  %v451_v27 = vld [vmem:[%s1046_s2] sm:$0xf] }
  0xb4   : > { %727 = vrot.lane.b32.xlu2 %v726_v25, %s843_s13 }
  0xb5   : > { %v736_v31 = vpack.i.bf16 %v300_v28, %v370_v29 }
  0xb7   : > { %423 = vrot.lane.b32.xlu1 %v404_v30, %s842_s12  ;;  %737 = vrot.lane.b32.xlu0 %v736_v31, %s844_s14 }
  0xb9   : > { %v406_v34 = vpop.f32.mrf.mxu2 }
  0xba   : > { %v434_v35 = vrot.slane %v406_v34, 4 }
  0xbc   : > { %427 = vrot.lane.b32.xlu2 %v426_v32, %s843_s13 }
  0xbf   : > { %732 = vrot.lane.b32.xlu1 %v731_v33, %s845_s23  ;;  %431 = vrot.lane.b32.xlu0 %v406_v34, %s845_s23  ;;  %s215_s23 = scalar_lea.vmem [#allocation2], %s582_s10 }
  0xc0   : > { %s496_s24 = sshll.u32 %s215_s23, 4  ;;  %s497_s24 = int_to_ptr.vmem [resolvable:$true] %s496_s24 }
  0xc4   : > { %455 = vperm.xlu2 %741, %v452_v41  }
  0xc7   : > { %435 = vrot.lane.b32.xlu1 %v434_v35, %s844_s14  ;;  %s494_s14 = scalar_lea.hbm %s1048_s4, %s619_s11 }
  0xc8   : > { %s498_s27 = sshll.u32 %s494_s14, 4  ;;  %s499_s27 = int_to_ptr.hbm [resolvable:$true] %s498_s27 }
  0xc9   : > { %s757_s30 = sshra.s32 %s499_s27, 4  ;;  %s758_s30 = int_to_ptr.hbm [resolvable:$true] %s757_s30 }
  0xca   : > { %s759_s18 = scalar_lea.hbm %s758_s30, 8  ;;  %p764_p4 = scmp.lt.s32.totalorder %s758_s30, %s1048_s4 }
  0xcb   : > { %p760_p0 = scmp.ne.s32.totalorder %s758_s30, %s759_s18  ;;  %p765_p5 = scmp.lt.s32.totalorder %s763_s9, %s759_s18 }
  0xcd   : > { %p761_p1 = pnand %p760_p0, %p923_p3  ;;  %p766_p6 = por %p765_p5, %p764_p4 }
  0xcf   : > { %p762_p2 = pneg %p761_p1 }
  0xd1   : > { %p767_p7 = pnand %p766_p6, %p762_p2 }
  0xfe   : > { %v412_v37 = vpop.permute.xlu2 %411 }
  0xff   : > { %v438_v61 = vsel %vm249_vm0, %v970_v10, %v412_v37 }
 0x106   : > { %v420_v44 = vpop.permute.xlu2 %419 }
 0x10e   : > { %v728_v55 = vpop.permute.xlu2 %727 }
 0x10f   : > { %v729_v63 = vunpack.i.l.bf16 %v728_v55 }
 0x111   : > { %v708_v36 = vpop.permute.xlu0 %707 }
 0x112   : > { %v709_v45 = vunpack.i.l.bf16 %v708_v36  ;;  %v710_v47 = vunpack.i.h.bf16 %v708_v36 }
 0x114   : > { %v374_v50 = vsel %vm249_vm0, %v966_v6, %v709_v45  ;;  %v304_v56 = vsel %vm249_vm0, %v964_v5, %v710_v47  ;;  %v730_v6 = vunpack.i.h.bf16 %v728_v55 }
 0x116   : > { %v428_v17 = vpop.permute.xlu2 %427 }
 0x119   : > { %v713_v38 = vpop.permute.xlu0 %712  ;;  %v718_v39 = vpop.permute.xlu1 %717 }
 0x11a   : > { %v714_v46 = vunpack.i.l.bf16 %v713_v38  ;;  %v715_v49 = vunpack.i.h.bf16 %v713_v38  ;;  %v719_v51 = vunpack.i.l.bf16 %v718_v39  ;;  %v720_v57 = vunpack.i.h.bf16 %v718_v39 }
 0x11c   : > { %v375_v52 = vsel %vm305_vm1, %v374_v50, %v714_v46  ;;  %v306_v58 = vsel %vm305_vm1, %v304_v56, %v715_v49 }
 0x11d   : > { %v376_v60 = vsel %vm307_vm2, %v375_v52, %v719_v51  ;;  %v308_v1 = vsel %vm307_vm2, %v306_v58, %v720_v57 }
 0x11e   : > { %v456_v28 = vpop.permute.xlu2 %455 }
 0x121   : > { %v723_v40 = vpop.permute.xlu1 %722  ;;  %v416_v42 = vpop.permute.xlu0 %415 }
 0x122   : > { %v724_v53 = vunpack.i.l.bf16 %v723_v40  ;;  %v725_v59 = vunpack.i.h.bf16 %v723_v40  ;;  %v439_v0 = vsel %vm305_vm1, %v438_v61, %v416_v42 }
 0x123   : > { %v440_v9 = vsel %vm307_vm2, %v439_v0, %v420_v44 }
 0x124   : > { %v377_v62 = vsel %vm309_vm3, %v376_v60, %v724_v53  ;;  %v310_v3 = vsel %vm309_vm3, %v308_v1, %v725_v59 }
 0x125   : > { %v378_v8 = vsel %vm311_vm4, %v377_v62, %v729_v63  ;;  %v312_v12 = vsel %vm311_vm4, %v310_v3, %v730_v6 }
 0x129   : > { %v424_v48 = vpop.permute.xlu1 %423  ;;  %v738_v54 = vpop.permute.xlu0 %737 }
 0x12a   : > { %v739_v7 = vunpack.i.l.bf16 %v738_v54  ;;  %v441_v11 = vsel %vm309_vm3, %v440_v9, %v424_v48  ;;  %v740_v18 = vunpack.i.h.bf16 %v738_v54 }
 0x12b   : > { %v442_v19 = vsel %vm311_vm4, %v441_v11, %v428_v17 }
 0x131   : > { %v733_v2 = vpop.permute.xlu1 %732  ;;  %v432_v15 = vpop.permute.xlu0 %431 }
 0x132   : > { %v735_v4 = vunpack.i.h.bf16 %v733_v2  ;;  %v734_v5 = vunpack.i.l.bf16 %v733_v2  ;;  %v443_v20 = vsel %vm313_vm6, %v442_v19, %v432_v15 }
 0x134   : > { %v379_v10 = vsel %vm313_vm6, %v378_v8, %v734_v5  ;;  %v314_v14 = vsel %vm313_vm6, %v312_v12, %v735_v4 }
 0x135   : > { %v380_v13 = vsel %vm315_vm5, %v379_v10, %v739_v7  ;;  %v316_v22 = vsel %vm315_vm5, %v314_v14, %v740_v18 }
 0x136   : > { %v446_v16 = vrot.slane %v380_v13, 4 }
 0x138   : > { %v449_v24 = vsel %vm448_vm7, %v316_v22, %v446_v16 }
 0x139   : > { %v436_v21 = vpop.permute.xlu1 %435 }
 0x13a   : > { %v444_v23 = vsel %vm315_vm5, %v443_v20, %v436_v21 }
 0x13b   : > { %v450_v25 = vpack.c.bf16 %v444_v23, %v449_v24 }
 0x13d   : > { %v464_v26 = vsel %vm462_vm8, %v450_v25, 0 }
 0x13e   : > { %473 = vmatpush.bf16.msra.mxu3 %v464_v26 }
 0x141   : > { %616 = vmatmul.msk.bf16.vlgmr.msra.gmra.mxu3 %vm458_vm9, %v451_v27 }
 0x1c4   : > { %v475_v29 = vpop.f32.mrf.mxu3 }
 0x1c5   : > { %v476_v30 = vadd.f32 %v475_v29, %v456_v28 }
 0x1c7   : > { %v479_v31 = vmax.f32 %v476_v30, 0.0 }
 0x1c9   : > { %480 = vst [vmem:[%s215_s23] sm:$0xff] %v479_v31 }
 0x1ca   : > { %770 = shalt.err (!%p767_p7)
}
 0x1cb   : > { %627 = dma.vmem_to_hbm [thread:$0]  (%p923_p3), %s497_s24, 128, %s499_s27, %s482_s19  }
 0x1cc   : > { %v477_v32 = vpop.f32.mrf.mxu3 }
 0x1cd PF: > { %p633_p9 = scmp.ge.s32.totalorder %s837_s22, 2  ;;  %s510_s8 = sand.u32 1, %s809_s15  }
 0x1ce   : > { %s511_s12 = scalar_lea.sflag [#allocation3], %s510_s8 }
 0x1cf   : > { %p630_p10 = pnand %p633_p9, %p932_p8 }
 0x1d1   : > { %p631_p11 = pneg %p630_p10 }
 0x1d3   : > { %804 = dma.done.wait (%p631_p11), %s511_s12, 128  }
 0x1d4   : > { %806 = vsyncadd (%p631_p11), %s511_s12, 4294967168  ;;  %s17_s22 = sadd.s32 1, %s837_s22   ;;  %s1051_s15 = smov %s813_s16 }
 0x1d5   : > { %p14_p12 = scmp.ge.s32.totalorder %s17_s22, 6   ;;  %s1052_s16 = smov %s817_s17 }
 0x1d6   : > { %s1053_s17 = smov %s941_s7  ;;  %s1054_s18 = smov %s829_s20 }
 0x1d7   : > { %s1055_s19 = smov %s833_s21  ;;  %s1056_s20 = smov %s1059_s25 }
 0x1d8   : > { %s1057_s21 = smov %s1063_s26  ;;  %16 = sbr.rel (!%p14_p12) target bundleno = 5 (0x5), region = 73 }
 0x1dd   :  { %517 = vsyncpa [#allocation3], 1 }
 0x1de   :  { %519 = vsyncpa [#allocation3 + $0x1], 1 }

</bundles_post_ra>
